<compile_context>
chip_gen: v7x
topology: tpu7x:2x2x1
jax: 0.10.0
libtpu: 0.0.40
codegen_flags: <defaults>
</compile_context>

<pallas_src>
import jax
import jax.numpy as jnp
from jax.experimental import pallas as pl
from jax.experimental.pallas import tpu as pltpu

_NEG_BIG = -1e30  # effectively -inf for padded vocab columns (exp -> 0)


def _generator_kernel(x_ref, w_ref, b_ref, o_ref, logits_ref):
    # x_ref:      (TM, d_model)   bf16
    # w_ref:      (d_model, Vp)   bf16   (constant block index -> DMA'd once)
    # b_ref:      (1, Vp)         f32
    # o_ref:      (TM, Vp)        out_dtype (bf16 by default)
    # logits_ref: (TM, Vp)        f32 VMEM scratch, reused in place
    logits_ref[...] = jnp.dot(
        x_ref[...], w_ref[...], preferred_element_type=jnp.float32
    ) + b_ref[...]
    m = jnp.max(logits_ref[...], axis=-1, keepdims=True)
    logits_ref[...] = logits_ref[...] - m              # shifted, in place
    lse = jnp.log(jnp.sum(jnp.exp(logits_ref[...]), axis=-1, keepdims=True))
    o_ref[...] = (logits_ref[...] - lse).astype(o_ref.dtype)


def prepare_generator_params(w, b):
    """One-time (init-path) parameter prep: cast weight to bf16 and pad the
    vocab axis to a multiple of 128 for lane-dense output stores.

    w: (d_model, vocab) — note: transposed vs. PyTorch nn.Linear's
       (vocab, d_model) so the kernel computes x @ W + b directly on the MXU.
    b: (vocab,)
    Returns (w_bf16_padded, b_f32_padded[1, Vp], vocab).
    """
    d_model, vocab = w.shape
    vocab_p = ((vocab + 127) // 128) * 128
    w_p = w.astype(jnp.bfloat16)
    b_p = b.astype(jnp.float32)
    if vocab_p != vocab:
        w_p = jnp.pad(w_p, ((0, 0), (0, vocab_p - vocab)))
        # -1e30 bias on padded columns: never the row max, exp() == 0 exactly.
        b_p = jnp.pad(b_p, (0, vocab_p - vocab), constant_values=_NEG_BIG)
    return w_p, b_p.reshape(1, vocab_p), vocab


def _vmem_budget_bytes():
    """Generation-aware VMEM budget (80% of capacity, conservative default
    that still fits v7x's 64 MiB per TensorCore if the query fails)."""
    cap = 64 << 20
    try:
        info = pltpu.get_tpu_info()
        cap = int(getattr(info, "vmem_capacity_bytes", cap))
    except Exception:
        pass
    return max(32 << 20, int(cap * 0.8))


def _vmem_bytes(tm, d_model, vocab_p, out_itemsize):
    return (2 * tm * d_model * 2          # double-buffered bf16 x tiles
            + d_model * vocab_p * 2       # resident bf16 weight (const index)
            + 8 * vocab_p * 4             # bias block (sublane padded), f32
            + 2 * tm * vocab_p * out_itemsize  # double-buffered output tiles
            + tm * vocab_p * 4)           # explicit f32 logits scratch


def generator_forward(x, w_p, b_p, vocab, *, out_dtype=jnp.bfloat16,
                      tile_rows=None):
    """x: (B, S, d_model); w_p/b_p from prepare_generator_params.
    Returns log_softmax(x @ W + b) with shape (B, S, vocab)."""
    B, S, d_model = x.shape
    d_model_w, vocab_p = w_p.shape
    assert d_model == d_model_w, (d_model, d_model_w)
    rows = B * S
    rows16 = ((rows + 15) // 16) * 16     # bf16 packs 16 rows per sublane grp
    out_itemsize = jnp.dtype(out_dtype).itemsize
    budget = _vmem_budget_bytes()

    # Row tile: largest MXU-friendly candidate that fits the VMEM budget.
    if tile_rows is None:
        tm = 16
        for cand in (512, 384, 256, 128, 64, 32, 16):
            if _vmem_bytes(cand, d_model, vocab_p, out_itemsize) + (2 << 20) <= budget:
                tm = cand
                break
    else:
        tm = max(16, (int(tile_rows) // 16) * 16)
    tm = max(16, min(tm, rows16))
    tm = (tm // 16) * 16
    padded_rows = pl.cdiv(rows, tm) * tm

    x2 = x.reshape(rows, d_model)
    if x2.dtype != jnp.bfloat16:
        # Ideally the previous layer already emits bf16 activations.
        x2 = x2.astype(jnp.bfloat16)
    if padded_rows != rows:
        x2 = jnp.pad(x2, ((0, padded_rows - rows), (0, 0)))

    est = _vmem_bytes(tm, d_model, vocab_p, out_itemsize)
    vmem_limit = min(budget, max(est + (4 << 20), 32 << 20))

    cost = pl.CostEstimate(
        flops=2 * padded_rows * d_model * vocab_p,
        transcendentals=padded_rows * vocab_p,
        bytes_accessed=(padded_rows * d_model * 2        # x (bf16)
                        + d_model * vocab_p * 2           # w (bf16, once)
                        + vocab_p * 4                     # b (f32)
                        + padded_rows * vocab_p * out_itemsize),
    )

    out = pl.pallas_call(
        _generator_kernel,
        out_shape=jax.ShapeDtypeStruct((padded_rows, vocab_p), out_dtype),
        grid_spec=pltpu.PrefetchScalarGridSpec(
            num_scalar_prefetch=0,
            grid=(padded_rows // tm,),
            in_specs=[
                pl.BlockSpec((tm, d_model), lambda i: (i, 0)),
                # Constant block index -> weight / bias fetched once.
                pl.BlockSpec((d_model, vocab_p), lambda i: (0, 0)),
                pl.BlockSpec((1, vocab_p), lambda i: (0, 0)),
            ],
            out_specs=pl.BlockSpec((tm, vocab_p), lambda i: (i, 0)),
            scratch_shapes=[pltpu.VMEM((tm, vocab_p), jnp.float32)],
        ),
        compiler_params=pltpu.CompilerParams(
            dimension_semantics=("parallel",),
            vmem_limit_bytes=vmem_limit),
        cost_estimate=cost,
    )(x2, w_p, b_p)

    return out[:rows, :vocab].reshape(B, S, vocab)


if __name__ == "__main__":
    # Small shapes consistent with the module's forward: (B, S, d_model).
    B, S, d_model, vocab = 2, 8, 32, 128

    key = jax.random.PRNGKey(0)
    kx, kw, kb = jax.random.split(key, 3)

    x = jax.random.normal(kx, (B, S, d_model), dtype=jnp.float32)
    # Deterministic synthetic parameters (no checkpoint load).
    w = (jax.random.normal(kw, (d_model, vocab), dtype=jnp.float32)
         * (1.0 / jnp.sqrt(d_model)))
    b = jax.random.normal(kb, (vocab,), dtype=jnp.float32) * 0.01

    # One-time param prep (hoisted cast + vocab padding).
    w_p, b_p, vocab_real = prepare_generator_params(w, b)

    out = generator_forward(x, w_p, b_p, vocab_real)   # bf16 output by default
    out = jax.block_until_ready(out)
    assert out.shape == (B, S, vocab)

    # Reference uses the same bf16 operands + f32 accumulation as the kernel.
    logits_ref = jnp.dot(
        x.reshape(B * S, d_model).astype(jnp.bfloat16),
        w.astype(jnp.bfloat16),
        preferred_element_type=jnp.float32) + b
    ref = jax.nn.log_softmax(logits_ref, axis=-1).reshape(B, S, vocab)
    assert jnp.allclose(out.astype(jnp.float32), ref, atol=5e-2, rtol=2e-2)

    print("KERNEL_OK")
</pallas_src>

<mosaic_0001>
module attributes {stable_mosaic.version = 11 : i64} {
  func.func @_generator_kernel(%arg0: i32, %arg1: memref<16x32xbf16, #tpu.memory_space<vmem>>, %arg2: memref<32x128xbf16, #tpu.memory_space<vmem>>, %arg3: memref<1x128xf32, #tpu.memory_space<vmem>>, %arg4: memref<16x128xbf16, #tpu.memory_space<vmem>>, %arg5: memref<16x128xf32, #tpu.memory_space<vmem>>) attributes {dimension_semantics = [#tpu.dimension_semantics<parallel>], iteration_bounds = array<i64: 1>, scalar_prefetch = 0 : i64, scratch_operands = 1 : i64, tpu.core_type = #tpu.core_type<tc>, window_params = [{transform_indices = @transform_0, window_bounds = array<i64: 16, 32>}, {pipeline_mode = #tpu.pipeline_mode<synchronous>, transform_indices = @transform_1, window_bounds = array<i64: 32, 128>}, {pipeline_mode = #tpu.pipeline_mode<synchronous>, transform_indices = @transform_2, window_bounds = array<i64: 1, 128>}, {transform_indices = @transform_3, window_bounds = array<i64: 16, 128>}]} {
    %c0 = arith.constant 0 : index
    %c0_0 = arith.constant 0 : index
    %0 = vector.load %arg1[%c0, %c0_0] : memref<16x32xbf16, #tpu.memory_space<vmem>>, vector<16x32xbf16>
    %c0_1 = arith.constant 0 : index
    %c0_2 = arith.constant 0 : index
    %1 = vector.load %arg2[%c0_1, %c0_2] : memref<32x128xbf16, #tpu.memory_space<vmem>>, vector<32x128xbf16>
    %cst = arith.constant dense<0.000000e+00> : vector<16x128xf32>
    %2 = tpu.matmul %0, %1, %cst {dimension_numbers = #tpu.dot_dimension_numbers<[1], [0], [0], [1], [0, 0, 1, 1], [], []>} : vector<16x32xbf16>, vector<32x128xbf16>, vector<16x128xf32> -> vector<16x128xf32>
    %c0_3 = arith.constant 0 : index
    %c0_4 = arith.constant 0 : index
    %3 = vector.load %arg3[%c0_3, %c0_4] : memref<1x128xf32, #tpu.memory_space<vmem>>, vector<1x128xf32>
    %4 = vector.broadcast %3 : vector<1x128xf32> to vector<16x128xf32>
    %5 = arith.addf %2, %4 : vector<16x128xf32>
    %c0_5 = arith.constant 0 : index
    %c0_6 = arith.constant 0 : index
    %6 = vector.load %arg5[%c0_5, %c0_6] : memref<16x128xf32, #tpu.memory_space<vmem>>, vector<16x128xf32>
    tpu.vector_store %arg5[%c0_5, %c0_6], %5 {strides = array<i32>} : memref<16x128xf32, #tpu.memory_space<vmem>>, vector<16x128xf32>,
    %c0_7 = arith.constant 0 : index
    %c0_8 = arith.constant 0 : index
    %7 = vector.load %arg5[%c0_7, %c0_8] : memref<16x128xf32, #tpu.memory_space<vmem>>, vector<16x128xf32>
    %cst_9 = arith.constant dense<0xFF800000> : vector<16xf32>
    %8 = vector.multi_reduction <maximumf>, %7, %cst_9 [1] : vector<16x128xf32> to vector<16xf32>
    %9 = vector.shape_cast %8 : vector<16xf32> to vector<16x1xf32>
    %c0_10 = arith.constant 0 : index
    %c0_11 = arith.constant 0 : index
    %10 = vector.load %arg5[%c0_10, %c0_11] : memref<16x128xf32, #tpu.memory_space<vmem>>, vector<16x128xf32>
    %11 = vector.broadcast %9 : vector<16x1xf32> to vector<16x128xf32>
    %12 = arith.subf %10, %11 : vector<16x128xf32>
    %c0_12 = arith.constant 0 : index
    %c0_13 = arith.constant 0 : index
    %13 = vector.load %arg5[%c0_12, %c0_13] : memref<16x128xf32, #tpu.memory_space<vmem>>, vector<16x128xf32>
    tpu.vector_store %arg5[%c0_12, %c0_13], %12 {strides = array<i32>} : memref<16x128xf32, #tpu.memory_space<vmem>>, vector<16x128xf32>,
    %c0_14 = arith.constant 0 : index
    %c0_15 = arith.constant 0 : index
    %14 = vector.load %arg5[%c0_14, %c0_15] : memref<16x128xf32, #tpu.memory_space<vmem>>, vector<16x128xf32>
    %15 = math.exp %14 : vector<16x128xf32>
    %cst_16 = arith.constant dense<0.000000e+00> : vector<16xf32>
    %16 = vector.multi_reduction <add>, %15, %cst_16 [1] : vector<16x128xf32> to vector<16xf32>
    %17 = vector.shape_cast %16 : vector<16xf32> to vector<16x1xf32>
    %18 = math.log %17 : vector<16x1xf32>
    %c0_17 = arith.constant 0 : index
    %c0_18 = arith.constant 0 : index
    %19 = vector.load %arg5[%c0_17, %c0_18] : memref<16x128xf32, #tpu.memory_space<vmem>>, vector<16x128xf32>
    %20 = vector.broadcast %18 : vector<16x1xf32> to vector<16x128xf32>
    %21 = arith.subf %19, %20 : vector<16x128xf32>
    %22 = arith.truncf %21 : vector<16x128xf32> to vector<16x128xbf16>
    %c0_19 = arith.constant 0 : index
    %c0_20 = arith.constant 0 : index
    %23 = vector.load %arg4[%c0_19, %c0_20] : memref<16x128xbf16, #tpu.memory_space<vmem>>, vector<16x128xbf16>
    tpu.vector_store %arg4[%c0_19, %c0_20], %22 {strides = array<i32>} : memref<16x128xbf16, #tpu.memory_space<vmem>>, vector<16x128xbf16>,
    return
  }
  func.func @transform_0(%arg0: i32) -> (i32, i32) {
    %c0_i32 = arith.constant 0 : i32
    %c0_i32_0 = arith.constant 0 : i32
    return %arg0, %c0_i32 : i32, i32
  }
  func.func @transform_1(%arg0: i32) -> (i32, i32) {
    %c0_i32 = arith.constant 0 : i32
    %c0_i32_0 = arith.constant 0 : i32
    %c0_i32_1 = arith.constant 0 : i32
    return %c0_i32, %c0_i32_0 : i32, i32
  }
  func.func @transform_2(%arg0: i32) -> (i32, i32) {
    %c0_i32 = arith.constant 0 : i32
    %c0_i32_0 = arith.constant 0 : i32
    %c0_i32_1 = arith.constant 0 : i32
    return %c0_i32, %c0_i32_0 : i32, i32
  }
  func.func @transform_3(%arg0: i32) -> (i32, i32) {
    %c0_i32 = arith.constant 0 : i32
    %c0_i32_0 = arith.constant 0 : i32
    return %arg0, %c0_i32 : i32, i32
  }
}

</mosaic_0001>

<bundles_post_ra>
// kernel: tpu_custom_call.1
= control target key start
LH: loop header
LB: loop body
LE: loop exit
PB: predicated region body
PF: predicated region fallthrough
CT: control target
= control target key end

     0   :  { %8 = vsyncpa [#allocation4], 0  ;;  %s365_s0 = inlined_call_operand.hbm [shape: bf16[16,32], index: 0, kind: input, shape index: {}]   ;;  %s366_s1 = inlined_call_operand.hbm [shape: bf16[32,128], index: 1, kind: input, shape index: {}]   ;;  %s367_s2 = inlined_call_operand.vmem [shape: f32[1,128], index: 2, kind: input, shape index: {}]   ;;  %s368_s3 = inlined_call_operand.hbm [shape: bf16[16,128], index: 3, kind: output, shape index: {}]  }
   0x1   :  { %9 = vsyncpa [#allocation7], 0 }
   0x2   :  { %10 = vsyncpa [#allocation5], 0  ;;  %s290_s12 = smov [#allocation3]   ;;  %s218_s16 = scalar_lea.hbm %s365_s0, 128 }
   0x3   :  { %s16_s13 = sshll.u32 %s290_s12, 4  ;;  %p219_p0 = scmp.ne.s32.totalorder %s365_s0, %s218_s16  ;;  %s17_s13 = int_to_ptr.vmem [resolvable:$true] %s16_s13 }
   0x4   :  { %p222_p1 = scmp.lt.u32.totalorder %s218_s16, %s365_s0 }
   0x6   :  { %p224_p2 = pnand %p222_p1, %p219_p0 }
   0x8   :  { %227 = shalt.err (!%p224_p2)
}
   0x9   :  { %s228_s21 = scalar_lea.vmem %s17_s13, 128  ;;  %p233_p4 = scmp.lt.s32.totalorder %s17_s13, %s17_s13 }
   0xa   :  { %p229_p3 = scmp.ne.s32.totalorder %s17_s13, %s228_s21  ;;  %p234_p5 = scmp.lt.s32.totalorder %s228_s21, %s228_s21 }
   0xc   :  { %p235_p6 = por %p234_p5, %p233_p4 }
   0xe   :  { %p236_p7 = pnand %p235_p6, %p229_p3 }
  0x10   :  { %239 = shalt.err (!%p236_p7)
}
  0x11   :  { %s291_s22 = smov 64   ;;  %s292_s23 = smov 4  }
  0x12   :  { %22 = dma.hbm_to_vmem [thread:$0]  %s365_s0, 128, %s17_s13, [#allocation4], %s291_s22, %s291_s22, %s292_s23  }
  0x13   :  { %s293_s26 = smov [#allocation6]   ;;  %s240_s30 = scalar_lea.hbm %s366_s1, 256 }
  0x14   :  { %s28_s27 = sshll.u32 %s293_s26, 4  ;;  %p241_p8 = scmp.ne.s32.totalorder %s366_s1, %s240_s30  ;;  %s29_s27 = int_to_ptr.vmem [resolvable:$true] %s28_s27 }
  0x15   :  { %p244_p9 = scmp.lt.u32.totalorder %s240_s30, %s366_s1 }
  0x17   :  { %p246_p10 = pnand %p244_p9, %p241_p8 }
  0x19   :  { %249 = shalt.err (!%p246_p10)
}
  0x1a   :  { %s250_s8 = scalar_lea.vmem %s29_s27, 256  ;;  %p255_p12 = scmp.lt.s32.totalorder %s29_s27, %s29_s27 }
  0x1b   :  { %p251_p11 = scmp.ne.s32.totalorder %s29_s27, %s250_s8  ;;  %p256_p13 = scmp.lt.s32.totalorder %s250_s8, %s250_s8 }
  0x1d   :  { %p257_p0 = por %p256_p13, %p255_p12 }
  0x1f   :  { %p258_p1 = pnand %p257_p0, %p251_p11 }
  0x21   :  { %261 = shalt.err (!%p258_p1)
}
  0x22   :  { %34 = dma.hbm_to_vmem [thread:$0]  %s366_s1, 256, %s29_s27, [#allocation7], %s291_s22, %s291_s22, %s292_s23  }
  0x23   :  { %284 = dma.done.wait [#allocation4], 128  }
  0x24   :  { %285 = vsyncadd [#allocation4], 4294967168 }
  0x25   :  { %286 = dma.done.wait [#allocation7], 256  }
  0x26   :  { %287 = vsyncadd [#allocation7], 4294967040  ;;  %v294_v0 = vmov 0.0   ;;  %vm295_vm0 = vmmov 0   ;;  %v207_v1 = vld [vmem:[#allocation6] sm:$0xff]   ;;  %v208_v2 = vld [vmem:[#allocation6 + $0x8] sm:$0xff]  }
  0x27   :  { %192 = vmatprep.subr.bf16.mxu0 %v294_v0  ;;  %196 = vmatprep.mubr.msk.bf16.mxu0 %vm295_vm0, %v294_v0  ;;  %v209_v3 = vld [vmem:[#allocation3] sm:$0xff]   ;;  %vm74_vm1 = vcmask 261120   ;;  %s296_s1 = smov [#allocation8]  }
  0x28   :  { %193 = vmatpush3.bf16.msra.mxu0 %v207_v1  ;;  %v175_v4 = vld [vmem:[%s367_s2] ss:$0 sm:$0xff]  ;;  %s162_s2 = sshll.u32 %s296_s1, 4  ;;  %s163_s2 = int_to_ptr.vmem [resolvable:$true] %s162_s2 }
  0x29   :  { %194 = vmatprep.subr.bf16.mxu0 %v294_v0  ;;  %s262_s12 = scalar_lea.vmem %s163_s2, 128  ;;  %p267_p3 = scmp.lt.s32.totalorder %s163_s2, %s163_s2 }
  0x2a   :  { %p263_p2 = scmp.ne.s32.totalorder %s163_s2, %s262_s12  ;;  %p268_p4 = scmp.lt.s32.totalorder %s262_s12, %s262_s12 }
  0x2c   :  { %195 = vmatpush3.bf16.msra.mxu0 %v208_v2  ;;  %p269_p5 = por %p268_p4, %p267_p3 }
  0x2e   :  { %p270_p6 = pnand %p269_p5, %p263_p2 }
  0x2f   :  { %197 = vmatmul.mubr.msk.bf16.vlgmr.msra.gmra.mrb[0].mxu0 %vm74_vm1, %v209_v3 }
 0x102   :  { %v112_v5 = vpop.f32.mrb[0].mxu0 }
 0x103   :  { %v113_v6 = vadd.f32 %v175_v4, %v112_v5  ;;  %v198_v7 = vpop.f32.mrb[1].mxu0 }
 0x104   :  { %v115_v8 = vpop.f32.mrb[2].mxu0 }
 0x105   :  { %123 = vmax.xlane.f32.xlu0 %v113_v6  ;;  %v199_v9 = vpop.f32.mrb[3].mxu0  ;;  %v116_v10 = vadd.f32 %v175_v4, %v115_v8 }
 0x109   :  { %125 = vmax.xlane.f32.xlu0 %v116_v10 }
 0x192   :  { %v124_v11 = vpop.xlane.xlu0 %123 }
 0x193   :  { %v127_v12 = vsub.f32 %v113_v6, %v124_v11 }
 0x195   :  { %v133_v13 = vmul.f32 1.442695, %v127_v12 }
 0x196   :  { %v126_v14 = vpop.xlane.xlu0 %125 }
 0x197   :  { %v128_v15 = vsub.f32 %v116_v10, %v126_v14  ;;  %210 = vpow2.f32 %v133_v13 }
 0x199   :  { %v135_v16 = vmul.f32 1.442695, %v128_v15 }
 0x19b   :  { %212 = vpow2.f32 %v135_v16 }
 0x1a1   :  { %v211_v17 = vpop.eup %210 }
 0x1a2   :  { %137 = vadd.xlane.f32.xlu1 %v211_v17 }
 0x1a5   :  { %v213_v18 = vpop.eup %212 }
 0x1a6   :  { %139 = vadd.xlane.f32.xlu1 %v213_v18 }
 0x22f   :  { %v138_v19 = vpop.xlane.xlu1 %137 }
 0x230   :  { %214 = vlog2.f32 %v138_v19 }
 0x233   :  { %v140_v20 = vpop.xlane.xlu1 %139 }
 0x234   :  { %216 = vlog2.f32 %v140_v20 }
 0x23a   :  { %v215_v21 = vpop.eup %214 }
 0x23b   :  { %v142_v22 = vmul.f32 0.6931472, %v215_v21 }
 0x23d   :  { %v145_v25 = vsub.f32 %v127_v12, %v142_v22 }
 0x23e   :  { %v217_v23 = vpop.eup %216 }
 0x23f   :  { %v144_v24 = vmul.f32 0.6931472, %v217_v23 }
 0x241   :  { %v146_v26 = vsub.f32 %v128_v15, %v144_v24 }
 0x243   :  { %v187_v27 = vpack.c.bf16 %v146_v26, %v145_v25 }
 0x245   :  { %188 = vst [vmem:[#allocation8] sm:$0xff] %v187_v27  }
 0x246   :  { %273 = shalt.err (!%p270_p6)
}
 0x247   :  { %s274_s15 = scalar_lea.hbm %s368_s3, 128 }
 0x248   :  { %p275_p7 = scmp.ne.s32.totalorder %s368_s3, %s274_s15  ;;  %p278_p8 = scmp.lt.u32.totalorder %s274_s15, %s368_s3 }
 0x24a   :  { %p280_p9 = pnand %p278_p8, %p275_p7 }
 0x24c   :  { %283 = shalt.err (!%p280_p9)
}
 0x24d   :  { %168 = dma.vmem_to_hbm [thread:$0]  %s163_s2, 128, %s368_s3, [#allocation5], %s291_s22, %s291_s22, %s292_s23  }
 0x24e   :  { %288 = dma.done.wait [#allocation5], 128  }
 0x24f   :  { %289 = vsyncadd [#allocation5], 4294967168 }
 0x250   :  { %172 = vsyncpa [#allocation4], 1 }
 0x251   :  { %173 = vsyncpa [#allocation7], 1 }
 0x252   :  { %174 = vsyncpa [#allocation5], 1 }

</bundles_post_ra>
